<compile_context>
chip_gen: v6e
topology: v6e:2x2x1
jax: 0.10.0
libtpu: 0.0.40
codegen_flags: <defaults>
</compile_context>

<pallas_src>
import math

import jax
import jax.numpy as jnp
import numpy as np
from jax.experimental import pallas as pl
from jax.experimental.pallas import tpu as pltpu

LANE = 128  # TPU lane width: feature/class dims are padded to multiples of this.


def _round_up(v, m):
    return (v + m - 1) // m * m


def _pad2(a, rows, cols):
    return jnp.pad(a, ((0, rows - a.shape[0]), (0, cols - a.shape[1])))


def _make_gcn_layer_kernel(activation, n_valid):
    """Build a row-tiled GraphConvolution kernel: out = act((adj @ h) @ W + b).

    activation: "relu" | "log_softmax" (over the last dim; padded cols masked).
    n_valid: number of real (unpadded) output columns (for the softmax mask).
    """

    def kernel(adj_ref, h_ref, w_ref, b_ref, out_ref, acc_ref):
        k = pl.program_id(1)

        @pl.when(k == 0)
        def _():
            acc_ref[...] = jnp.zeros_like(acc_ref)

        # Aggregate the layer input: acc += adj[i, k] @ h[k].
        # bf16 x bf16 MXU matmul, f32 accumulation.
        acc_ref[...] += jnp.dot(adj_ref[...], h_ref[...],
                                preferred_element_type=jnp.float32)

        @pl.when(k == pl.num_programs(1) - 1)
        def _():
            # Weight transform + bias (epilogue, once per row block), all f32
            # element-wise math.
            z = jnp.dot(acc_ref[...].astype(jnp.bfloat16), w_ref[...],
                        preferred_element_type=jnp.float32) + b_ref[...]
            if activation == "relu":
                out_ref[...] = jnp.maximum(z, 0.0).astype(out_ref.dtype)
            else:  # log_softmax over the class axis; mask padded columns first
                col = jax.lax.broadcasted_iota(jnp.int32, z.shape, 1)
                z = jnp.where(col < n_valid, z, -1e30)
                m = jnp.max(z, axis=1, keepdims=True)
                zc = z - m
                lse = jnp.log(jnp.sum(jnp.exp(zc), axis=1, keepdims=True))
                out_ref[...] = (zc - lse).astype(out_ref.dtype)

    return kernel


def _gcn_layer(adj, h, w, b, *, activation, n_valid=0, out_dtype,
               tm=128, tk=128):
    """One GraphConvolution layer as a pallas_call.

    adj: (N_pad, N_pad) bf16, h: (N_pad, F_in_pad) bf16,
    w: (F_in_pad, F_out_pad) bf16, b: (1, F_out_pad) f32.
    """
    n_pad = adj.shape[0]
    f_in = h.shape[1]
    f_out = w.shape[1]
    grid = (n_pad // tm, n_pad // tk)

    def nbytes(a):
        return a.size * a.dtype.itemsize

    cost = pl.CostEstimate(
        flops=2 * n_pad * n_pad * f_in + 2 * n_pad * f_in * f_out,
        transcendentals=(n_pad * f_out if activation == "log_softmax" else 0),
        bytes_accessed=(nbytes(adj) + grid[0] * nbytes(h) + nbytes(w)
                        + nbytes(b)
                        + n_pad * f_out * jnp.dtype(out_dtype).itemsize),
    )

    return pl.pallas_call(
        _make_gcn_layer_kernel(activation, n_valid),
        out_shape=jax.ShapeDtypeStruct((n_pad, f_out), out_dtype),
        grid=grid,
        in_specs=[
            pl.BlockSpec((tm, tk), lambda i, k: (i, k)),       # adj block
            pl.BlockSpec((tk, f_in), lambda i, k: (k, 0)),     # input features
            pl.BlockSpec((f_in, f_out), lambda i, k: (0, 0)),  # weights (resident)
            pl.BlockSpec((1, f_out), lambda i, k: (0, 0)),     # bias (resident)
        ],
        out_specs=pl.BlockSpec((tm, f_out), lambda i, k: (i, 0)),
        scratch_shapes=[pltpu.VMEM((tm, f_in), jnp.float32)],
        compiler_params=pltpu.CompilerParams(
            dimension_semantics=("parallel", "arbitrary")),
        cost_estimate=cost,
    )(adj, h, w, b)


def gcn_3l_forward(x, adj, params, n_class, *, tm=128, tk=128):
    """3-layer GCN forward pass (eval mode) built from row-tiled Pallas layers."""
    n = x.shape[0]
    n_pad = _round_up(n, (tm * tk) // math.gcd(tm, tk))
    f0 = _round_up(x.shape[1], LANE)
    f1 = _round_up(params["w1"].shape[1], LANE)
    f2 = _round_up(params["w2"].shape[1], LANE)
    f3 = _round_up(params["w3"].shape[1], LANE)

    # Zero-pad everything to lane-dense shapes; MXU operands stored as bf16,
    # biases kept f32 for the f32 element-wise epilogue.
    adj_p = _pad2(adj, n_pad, n_pad).astype(jnp.bfloat16)
    x_p = _pad2(x, n_pad, f0).astype(jnp.bfloat16)
    w1 = _pad2(params["w1"], f0, f1).astype(jnp.bfloat16)
    w2 = _pad2(params["w2"], f1, f2).astype(jnp.bfloat16)
    w3 = _pad2(params["w3"], f2, f3).astype(jnp.bfloat16)
    b1 = _pad2(params["b1"], 1, f1).astype(jnp.float32)
    b2 = _pad2(params["b2"], 1, f2).astype(jnp.float32)
    b3 = _pad2(params["b3"], 1, f3).astype(jnp.float32)

    h1 = _gcn_layer(adj_p, x_p, w1, b1, activation="relu",
                    out_dtype=jnp.bfloat16, tm=tm, tk=tk)
    # TODO(synk): F.dropout is identity here (eval mode); training-mode dropout
    # would need pltpu.prng_seed / prng_random_bits and a training flag.
    h2 = _gcn_layer(adj_p, h1, w2, b2, activation="relu",
                    out_dtype=jnp.bfloat16, tm=tm, tk=tk)
    out_p = _gcn_layer(adj_p, h2, w3, b3, activation="log_softmax",
                       n_valid=n_class, out_dtype=jnp.float32, tm=tm, tk=tk)
    # Padded rows / padded class columns are sliced away (they never affect the
    # valid entries: zero-padded adj/weights and the -1e30 softmax mask).
    return out_p[:n, :n_class]


def init_params(key, n_feature, n_hidden1, n_hidden2, n_class):
    """Deterministic parameter init mirroring the PyTorch module's reset_parameters:
    kaiming_uniform-style for weights, uniform(-1/sqrt(out), 1/sqrt(out)) for biases."""
    def kaiming_uniform(k, fan_in, fan_out):
        # nn.init.kaiming_uniform_ convention differs slightly (dim-1 as fan_in);
        # same scale of init, not bit-identical to torch.
        bound = math.sqrt(6.0 / fan_in)
        return jax.random.uniform(k, (fan_in, fan_out), jnp.float32,
                                  minval=-bound, maxval=bound)

    def bias_uniform(k, fan_out):
        p = 1.0 / math.sqrt(fan_out)
        return jax.random.uniform(k, (1, fan_out), jnp.float32,
                                  minval=-p, maxval=p)

    k1, k2, k3, k4, k5, k6 = jax.random.split(key, 6)
    return {
        "w1": kaiming_uniform(k1, n_feature, n_hidden1),
        "b1": bias_uniform(k2, n_hidden1),
        "w2": kaiming_uniform(k3, n_hidden1, n_hidden2),
        "b2": bias_uniform(k4, n_hidden2),
        "w3": kaiming_uniform(k5, n_hidden2, n_class),
        "b3": bias_uniform(k6, n_class),
    }


def gcn_3l_reference(x, adj, params):
    """Pure-JAX reference mirroring the kernel numerics: bf16 MXU inputs, f32
    accumulation, aggregate-first ordering ((adj@h)@W == adj@(h@W)), bf16
    intermediate activations, f32 element-wise math."""
    def mm(a, b):
        return jnp.dot(a.astype(jnp.bfloat16), b.astype(jnp.bfloat16),
                       preferred_element_type=jnp.float32)

    h = jnp.maximum(mm(mm(adj, x), params["w1"]) + params["b1"], 0.0)
    h = h.astype(jnp.bfloat16)
    h = jnp.maximum(mm(mm(adj, h), params["w2"]) + params["b2"], 0.0)
    h = h.astype(jnp.bfloat16)
    z = mm(mm(adj, h), params["w3"]) + params["b3"]
    m = jnp.max(z, axis=1, keepdims=True)
    zc = z - m
    return zc - jnp.log(jnp.sum(jnp.exp(zc), axis=1, keepdims=True))


if __name__ == "__main__":
    # Small synthetic graph: N nodes, dense symmetrically-normalized adjacency.
    N = 200
    n_feature = 16
    n_hidden1 = 32
    n_hidden2 = 16
    n_class = 7

    key = jax.random.PRNGKey(0)
    k_x, k_adj, k_params = jax.random.split(key, 3)

    x = jax.random.normal(k_x, (N, n_feature), dtype=jnp.float32)

    # Random symmetric adjacency with self-loops, A_hat = D^-1/2 (A + I) D^-1/2.
    a = (jax.random.uniform(k_adj, (N, N)) > 0.9).astype(jnp.float32)
    a = jnp.maximum(a, a.T) + jnp.eye(N, dtype=jnp.float32)
    deg = jnp.sum(a, axis=1)
    d_inv_sqrt = 1.0 / jnp.sqrt(deg)
    adj = a * d_inv_sqrt[:, None] * d_inv_sqrt[None, :]

    params = init_params(k_params, n_feature, n_hidden1, n_hidden2, n_class)

    out = jax.block_until_ready(gcn_3l_forward(x, adj, params, n_class))
    ref = jax.block_until_ready(gcn_3l_reference(x, adj, params))

    assert out.shape == (N, n_class)
    # bf16 MXU inputs in both paths; tolerance covers accumulation-order deltas.
    np.testing.assert_allclose(np.asarray(out), np.asarray(ref),
                               rtol=5e-3, atol=5e-3)

    print("KERNEL_OK")
</pallas_src>

<mosaic_0001>
module attributes {stable_mosaic.version = 11 : i64} {
  func.func @kernel(%arg0: i32, %arg1: i32, %arg2: memref<128x128xbf16, #tpu.memory_space<vmem>>, %arg3: memref<128x128xbf16, #tpu.memory_space<vmem>>, %arg4: memref<128x128xbf16, #tpu.memory_space<vmem>>, %arg5: memref<1x128xf32, #tpu.memory_space<vmem>>, %arg6: memref<128x128xbf16, #tpu.memory_space<vmem>>, %arg7: memref<128x128xf32, #tpu.memory_space<vmem>>) attributes {dimension_semantics = [#tpu.dimension_semantics<parallel>, #tpu.dimension_semantics<arbitrary>], iteration_bounds = array<i64: 2, 2>, scalar_prefetch = 0 : i64, scratch_operands = 1 : i64, tpu.core_type = #tpu.core_type<tc>, window_params = [{transform_indices = @transform_0, window_bounds = array<i64: 128, 128>}, {transform_indices = @transform_1, window_bounds = array<i64: 128, 128>}, {pipeline_mode = #tpu.pipeline_mode<synchronous>, transform_indices = @transform_2, window_bounds = array<i64: 128, 128>}, {pipeline_mode = #tpu.pipeline_mode<synchronous>, transform_indices = @transform_3, window_bounds = array<i64: 1, 128>}, {transform_indices = @transform_4, window_bounds = array<i64: 128, 128>}]} {
    %c0_i32 = arith.constant 0 : i32
    %0 = arith.cmpi eq, %arg1, %c0_i32 : i32
    %1 = arith.extui %0 : i1 to i32
    %c0_i32_0 = arith.constant 0 : i32
    %2 = arith.cmpi ne, %1, %c0_i32_0 : i32
    scf.if %2 {
      %cst_9 = arith.constant 0.000000e+00 : f32
      %12 = vector.broadcast %cst_9 : f32 to vector<128x128xf32>
      %c0_10 = arith.constant 0 : index
      %c0_11 = arith.constant 0 : index
      %13 = vector.load %arg7[%c0_10, %c0_11] : memref<128x128xf32, #tpu.memory_space<vmem>>, vector<128x128xf32>
      tpu.vector_store %arg7[%c0_10, %c0_11], %12 {strides = array<i32>} : memref<128x128xf32, #tpu.memory_space<vmem>>, vector<128x128xf32>,
    } else {
    }
    %c0 = arith.constant 0 : index
    %c0_1 = arith.constant 0 : index
    %3 = vector.load %arg7[%c0, %c0_1] : memref<128x128xf32, #tpu.memory_space<vmem>>, vector<128x128xf32>
    %c0_2 = arith.constant 0 : index
    %c0_3 = arith.constant 0 : index
    %4 = vector.load %arg2[%c0_2, %c0_3] : memref<128x128xbf16, #tpu.memory_space<vmem>>, vector<128x128xbf16>
    %c0_4 = arith.constant 0 : index
    %c0_5 = arith.constant 0 : index
    %5 = vector.load %arg3[%c0_4, %c0_5] : memref<128x128xbf16, #tpu.memory_space<vmem>>, vector<128x128xbf16>
    %cst = arith.constant dense<0.000000e+00> : vector<128x128xf32>
    %6 = tpu.matmul %4, %5, %cst {dimension_numbers = #tpu.dot_dimension_numbers<[1], [0], [0], [1], [0, 0, 1, 1], [], []>} : vector<128x128xbf16>, vector<128x128xbf16>, vector<128x128xf32> -> vector<128x128xf32>
    %7 = arith.addf %3, %6 : vector<128x128xf32>
    %c0_6 = arith.constant 0 : index
    %c0_7 = arith.constant 0 : index
    %8 = vector.load %arg7[%c0_6, %c0_7] : memref<128x128xf32, #tpu.memory_space<vmem>>, vector<128x128xf32>
    tpu.vector_store %arg7[%c0_6, %c0_7], %7 {strides = array<i32>} : memref<128x128xf32, #tpu.memory_space<vmem>>, vector<128x128xf32>,
    %c1_i32 = arith.constant 1 : i32
    %9 = arith.cmpi eq, %arg1, %c1_i32 : i32
    %10 = arith.extui %9 : i1 to i32
    %c0_i32_8 = arith.constant 0 : i32
    %11 = arith.cmpi ne, %10, %c0_i32_8 : i32
    scf.if %11 {
      %c0_9 = arith.constant 0 : index
      %c0_10 = arith.constant 0 : index
      %12 = vector.load %arg7[%c0_9, %c0_10] : memref<128x128xf32, #tpu.memory_space<vmem>>, vector<128x128xf32>
      %13 = arith.truncf %12 : vector<128x128xf32> to vector<128x128xbf16>
      %c0_11 = arith.constant 0 : index
      %c0_12 = arith.constant 0 : index
      %14 = vector.load %arg4[%c0_11, %c0_12] : memref<128x128xbf16, #tpu.memory_space<vmem>>, vector<128x128xbf16>
      %cst_13 = arith.constant dense<0.000000e+00> : vector<128x128xf32>
      %15 = tpu.matmul %13, %14, %cst_13 {dimension_numbers = #tpu.dot_dimension_numbers<[1], [0], [0], [1], [0, 0, 1, 1], [], []>} : vector<128x128xbf16>, vector<128x128xbf16>, vector<128x128xf32> -> vector<128x128xf32>
      %c0_14 = arith.constant 0 : index
      %c0_15 = arith.constant 0 : index
      %16 = vector.load %arg5[%c0_14, %c0_15] : memref<1x128xf32, #tpu.memory_space<vmem>>, vector<1x128xf32>
      %17 = vector.broadcast %16 : vector<1x128xf32> to vector<128x128xf32>
      %18 = arith.addf %15, %17 : vector<128x128xf32>
      %cst_16 = arith.constant 0.000000e+00 : f32
      %19 = vector.broadcast %cst_16 : f32 to vector<128x128xf32>
      %20 = arith.maximumf %18, %19 : vector<128x128xf32>
      %21 = arith.truncf %20 : vector<128x128xf32> to vector<128x128xbf16>
      %c0_17 = arith.constant 0 : index
      %c0_18 = arith.constant 0 : index
      %22 = vector.load %arg6[%c0_17, %c0_18] : memref<128x128xbf16, #tpu.memory_space<vmem>>, vector<128x128xbf16>
      tpu.vector_store %arg6[%c0_17, %c0_18], %21 {strides = array<i32>} : memref<128x128xbf16, #tpu.memory_space<vmem>>, vector<128x128xbf16>,
    } else {
    }
    return
  }
  func.func @transform_0(%arg0: i32, %arg1: i32) -> (i32, i32) {
    %c0_i32 = arith.constant 0 : i32
    return %arg0, %arg1 : i32, i32
  }
  func.func @transform_1(%arg0: i32, %arg1: i32) -> (i32, i32) {
    %c0_i32 = arith.constant 0 : i32
    %c0_i32_0 = arith.constant 0 : i32
    return %arg1, %c0_i32 : i32, i32
  }
  func.func @transform_2(%arg0: i32, %arg1: i32) -> (i32, i32) {
    %c0_i32 = arith.constant 0 : i32
    %c0_i32_0 = arith.constant 0 : i32
    %c0_i32_1 = arith.constant 0 : i32
    return %c0_i32, %c0_i32_0 : i32, i32
  }
  func.func @transform_3(%arg0: i32, %arg1: i32) -> (i32, i32) {
    %c0_i32 = arith.constant 0 : i32
    %c0_i32_0 = arith.constant 0 : i32
    %c0_i32_1 = arith.constant 0 : i32
    return %c0_i32, %c0_i32_0 : i32, i32
  }
  func.func @transform_4(%arg0: i32, %arg1: i32) -> (i32, i32) {
    %c0_i32 = arith.constant 0 : i32
    %c0_i32_0 = arith.constant 0 : i32
    return %arg0, %c0_i32 : i32, i32
  }
}

</mosaic_0001>

<bundles_post_ra>
// kernel: tpu_custom_call.1
= control target key start
LH: loop header
LB: loop body
LE: loop exit
PB: predicated region body
PF: predicated region fallthrough
CT: control target
= control target key end

     0   :  { %s2050_s0 = inlined_call_operand.hbm [shape: bf16[256,256], index: 0, kind: input, shape index: {}]   ;;  %s2051_s1 = inlined_call_operand.hbm [shape: bf16[256,128], index: 1, kind: input, shape index: {}]   ;;  %s2052_s2 = inlined_call_operand.hbm [shape: bf16[128,128], index: 2, kind: input, shape index: {}]   ;;  %s2053_s3 = inlined_call_operand.vmem [shape: f32[1,128], index: 3, kind: input, shape index: {}]   ;;  %s2054_s4 = inlined_call_operand.hbm [shape: bf16[256,128], index: 4, kind: output, shape index: {}]  }
   0x1   :  { %2074 = sst [smem:[#allocation23_spill]] %s2052_s2 }
   0x2   :  { %2075 = sst [smem:[#allocation24_spill]] %s2053_s3 }
   0x3   :  { %2076 = sst [smem:[#allocation25_spill]] %s2054_s4 }
   0x4   :  { %9 = vsyncpa [#allocation4], 0 }
   0x5   :  { %11 = vsyncpa [#allocation4 + $0x1], 0 }
   0x6   :  { %12 = vsyncpa [#allocation7], 0 }
   0x7   :  { %14 = vsyncpa [#allocation7 + $0x1], 0 }
   0x8   :  { %15 = vsyncpa [#allocation5], 0 }
   0x9   :  { %17 = vsyncpa [#allocation5 + $0x1], 0  ;;  %s1709_s15 = smov 0   ;;  %s1711_s16 = smov 0  }
   0xa   :  { %s1713_s17 = smov 0   ;;  %s1715_s18 = smov 0  }
   0xb   :  { %s1717_s19 = smov 0   ;;  %s1719_s20 = smov 0  }
   0xc   :  { %s1721_s21 = smov 0   ;;  %s1723_s22 = smov 0  }
   0xd   :  { %s1725_s23 = smov 0   ;;  %s1727_s24 = smov 0  }
   0xe   :  { %s1729_s25 = smov 0   ;;  %s1731_s26 = smov 0  }
   0xf   :  { %s1733_s27 = smov 0   ;;  %s1735_s28 = smov 0  }
  0x10 LB: > { %2077 = sst [smem:[#allocation14_spill]] %s1620_s15  ;;  %s1776_s29 = sadd.s32 4294967295, %s1672_s28   ;;  %s1672_s28 = sphi %s1735_s28, %s23_s28   ;;  %s1668_s27 = sphi %s1733_s27, %s2132_s27   ;;  %s1664_s26 = sphi %s1731_s26, %s2131_s26   ;;  %s1660_s25 = sphi %s1729_s25, %s2130_s25   ;;  %s1656_s24 = sphi %s1727_s24, %s2129_s24   ;;  %s1652_s23 = sphi %s1725_s23, %s2128_s23   ;;  %s1648_s22 = sphi %s1723_s22, %s2127_s22   ;;  %s1644_s21 = sphi %s1721_s21, %s2126_s21   ;;  %s1640_s20 = sphi %s1719_s20, %s2125_s20   ;;  %s1636_s19 = sphi %s1717_s19, %s2124_s19   ;;  %s1632_s18 = sphi %s1715_s18, %s2123_s18   ;;  %s1628_s17 = sphi %s1713_s17, %s2122_s17   ;;  %s1624_s16 = sphi %s1711_s16, %s2121_s16   ;;  %s1620_s15 = sphi %s1709_s15, %s2120_s15  }
  0x11   : > { %2078 = sst [smem:[#allocation15_spill]] %s1624_s16  ;;  %s1008_s30 = sadd.s32 4294967294, %s1672_s28  }
  0x12   : > { %2079 = sst [smem:[#allocation16_spill]] %s1656_s24  ;;  %p57_p0 = scmp.ne.s32.totalorder %s1648_s22, %s1644_s21 }
  0x13   : > { %2080 = sst [smem:[#allocation17_spill]] %s1660_s25  ;;  %p2073_p1 = scmp.eq.s32.totalorder %s1776_s29, 0 }
  0x14   : > { %2081 = sst [smem:[#allocation18_spill]] %s1776_s29  ;;  %p83_p2 = scmp.ne.s32.totalorder %s1636_s19, %s1632_s18 }
  0x15   : > { %p1785_p3 = por %p2073_p1, %p57_p0  ;;  %p148_p4 = scmp.ne.s32.totalorder %s1628_s17, %s1624_s16 }
  0x16   : > { %p1793_p5 = por %p83_p2, %p2073_p1  ;;  %p149_p6 = scmp.eq.s32.totalorder %s1776_s29, 3 }
  0x17   : > { %p154_p7 = scmp.ne.s32.totalorder %s1624_s16, %s1620_s15  ;;  %p155_p8 = scmp.eq.s32.totalorder %s1008_s30, 3 }
  0x18   : > { %s2083_s7 = scalar_select %p1793_p5, 1, 0 }
  0x19   : > { %p1800_p9 = por %p149_p6, %p148_p4  ;;  %p1009_p10 = scmp.ge.s32.totalorder %s1672_s28, 1 }
  0x1a   : > { %2084 = sst [smem:[#allocation19_spill]] %s2083_s7  ;;  %p1805_p11 = por %p155_p8, %p154_p7 }
  0x1b   : > { %s2085_s8 = scalar_select %p1800_p9, 1, 0 }
  0x1c   : > { %s2087_s9 = scalar_select %p1805_p11, 1, 0 }
  0x1d   : > { %2086 = sst [smem:[#allocation20_spill]] %s2085_s8  ;;  %p162_p12 = scmp.lt.s32.totalorder %s1672_s28, 5 }
  0x1e   : > { %2088 = sst [smem:[#allocation21_spill]] %s2087_s9  ;;  %s1674_s11 = smov [#allocation8]  }
  0x1f   : > { %p1810_p13 = pnand %p1009_p10, %p162_p12  ;;  %s174_s12 = sshll.u32 %s1674_s11, 4  ;;  %s175_s12 = int_to_ptr.vmem [resolvable:$true] %s174_s12 }
  0x20   : > { %s1449_s13 = scalar_lea.vmem %s175_s12, 1024  ;;  %p1457_p9 = scmp.lt.s32.totalorder %s175_s12, %s175_s12 }
  0x21   : > { %p1276_p0 = pneg %p1810_p13  ;;  %p1450_p6 = scmp.ne.s32.totalorder %s175_s12, %s1449_s13 }
  0x22   : > { %p1458_p11 = scmp.lt.s32.totalorder %s1449_s13, %s1449_s13 }
  0x23   : > { %p1277_p2 = pnand %p1276_p0, %p2073_p1 }
  0x24   : > { %p1459_p5 = por %p1458_p11, %p1457_p9 }
  0x25   : > { %p1440_p4 = pneg %p1277_p2 }
  0x27   : > { %p1452_p7 = pnand %p1450_p6, %p1440_p4 }
  0x29   : > { %p1453_p8 = pneg %p1452_p7 }
  0x2b   : > { %p1460_p10 = pnand %p1459_p5, %p1453_p8 }
  0x2d   : > { %1463 = shalt.err (!%p1460_p10)
}
  0x2e   : > { %s2058_s14 = smov 64   ;;  %s2060_s18 = smov 4  }
  0x2f   : > { %s2090_s2 = sld [smem:[#allocation23_spill]]  ;;  %s32_s11 = sadd.s32 1, %s1664_s26 }
  0x30   : > { %p33_p5 = scmp.ge.s32.totalorder %s32_s11, 2  ;;  %s35_s13 = sadd.s32 1, %s1668_s27 }
  0x31   : > { %s44_s5 = sadd.s32 1, %s1652_s23  ;;  %p51_p9 = scmp.ne.s32.totalorder %s1652_s23, %s1648_s22 }
  0x32   : > { %s2134_s11 = smov (%p33_p5, %s32_s11), 0  ;;  %s2136_s13 = smov (!%p33_p5, %s35_s13), %s1668_s27 }
  0x33   : > { %2091 = sst [smem:[#allocation22_spill]] %s2134_s11  ;;  %s1834_s9 = ssub.s32 %s1664_s26, %s2134_s11 }
  0x34   : > { %p52_p11 = scmp.eq.s32.totalorder %s1672_s28, 0  ;;  %p37_p12 = scmp.ge.s32.totalorder %s2136_s13, 2 }
  0x35   : > { %1279 = dma.hbm_to_vmem [thread:$0]  (!%p1277_p2), %s2090_s2, 1024, %s175_s12, [#allocation7], %s2058_s14, %s2058_s14, %s2060_s18  }
  0x36   : > { %p68_p0 = scmp.eq.s32.totalorder %s1834_s9, 0  ;;  %p1840_p2 = por %p52_p11, %p51_p9 }
  0x37   : > { %p1292_p4 = scmp.lt.s32.totalorder %s1672_s28, 4  ;;  %s2138_s13 = smov (%p37_p12, %s2136_s13), 0 }
  0x38   : > { %s191_s21 = sand.u32 1, %s1652_s23   ;;  %s1072_s30 = sshll.u32 %s1668_s27, 5 }
  0x39   : > { %s39_s14 = ssub.s32 %s1668_s27, %s2138_s13  ;;  %s1012_s2 = sshll.u32 %s191_s21, 6 }
  0x3a   : > { %s41_s18 = sor.u32 %s1834_s9, %s39_s14  ;;  %p136_p6 = scmp.eq.s32.totalorder %s39_s14, 0 }
  0x3b   : > { %p42_p7 = scmp.eq.s32.totalorder %s41_s18, 0  ;;  %s2093_s11 = sadd.s32 1, %s1628_s17 }
  0x3c   : > { %s1855_s15 = scalar_select %p136_p6, %s1628_s17, %s2093_s11  }
  0x3d   : > { %s1858_s4 = scalar_select %p42_p7, %s1652_s23, %s44_s5  }
  0x3e   : > { %s201_s8 = sadd.s32 %s1664_s26, %s1072_s30  ;;  %s195_s3 = scalar_lea.vmem [#allocation3], %s1012_s2 }
  0x3f   : > { %s1015_s25 = sshll.u32 %s201_s8, 6  ;;  %s204_s24 = sshll.u32 %s195_s3, 4  ;;  %s205_s24 = int_to_ptr.vmem [resolvable:$true] %s204_s24 }
  0x40   : > { %s203_s29 = scalar_lea.hbm %s2050_s0, %s1015_s25  ;;  %p1868_p8 = pnand %p1292_p4, %p1840_p2 }
  0x41   : > { %s192_s11 = scalar_lea.sflag [#allocation4], %s191_s21  ;;  %s1477_s5 = scalar_lea.vmem %s205_s24, 1024 }
  0x42   : > { %p1466_p10 = pneg %p1868_p8  ;;  %p1478_p5 = scmp.ne.s32.totalorder %s205_s24, %s1477_s5 }
  0x43   : > { %s1677_s2 = smov [#allocation3]  }
  0x44   : > { %p1480_p9 = pnand %p1478_p5, %p1466_p10  ;;  %s1482_s3 = sshll.u32 %s1677_s2, 4  ;;  %s1483_s3 = int_to_ptr.vmem [resolvable:$false] %s1482_s3 }
  0x45   : > { %s1484_s16 = scalar_lea.vmem %s1483_s3, 2048  ;;  %p1485_p6 = scmp.lt.s32.totalorder %s205_s24, %s1483_s3 }
  0x46   : > { %p1481_p12 = pneg %p1480_p9  ;;  %p1486_p7 = scmp.lt.s32.totalorder %s1484_s16, %s1477_s5 }
  0x48   : > { %p1487_p1 = por %p1486_p7, %p1485_p6 }
  0x4a   : > { %p1488_p2 = pnand %p1487_p1, %p1481_p12 }
  0x4c   : > { %1491 = shalt.err (!%p1488_p2)
}
  0x4d   : > { %s1678_s25 = smov 128   ;;  %s2095_s7 = smov 4  }
  0x4e   : > { %s2096_s8 = smov 64   ;;  %s70_s12 = sadd.s32 1, %s1640_s20 }
  0x4f   : > { %1283 = dma.hbm_to_vmem [thread:$0]  (!%p1868_p8), %s203_s29, 1024, %s205_s24, %s192_s11, %s1678_s25, %s2096_s8, %s2095_s7  }
  0x50   : > { %p77_p10 = scmp.ne.s32.totalorder %s1640_s20, %s1636_s19  ;;  %s216_s30 = sand.u32 1, %s1640_s20  }
  0x51   : > { %s1885_s21 = scalar_select %p68_p0, %s1640_s20, %s70_s12  }
  0x52   : > { %p79_p1 = por %p77_p10, %p52_p11  ;;  %s1073_s14 = sshll.u32 %s1664_s26, 10 }
  0x53   : > { %s1016_s5 = sshll.u32 %s216_s30, 6  ;;  %s224_s16 = scalar_lea.hbm %s2051_s1, %s1073_s14 }
  0x54   : > { %p1896_p5 = pnand %p1292_p4, %p79_p1  ;;  %s218_s24 = scalar_lea.vmem [#allocation6], %s1016_s5 }
  0x55   : > { %s225_s29 = sshll.u32 %s218_s24, 4  ;;  %s2098_s9 = sand.u32 1, %s1672_s28   ;;  %s226_s29 = int_to_ptr.vmem [resolvable:$true] %s225_s29 }
  0x56   : > { %s215_s11 = scalar_lea.sflag [#allocation7], %s2098_s9  ;;  %p1494_p11 = pneg %p1896_p5 }
  0x57   : > { %s1505_s25 = scalar_lea.vmem %s226_s29, 1024  ;;  %s1679_s12 = smov [#allocation6]  }
  0x58   : > { %p1506_p0 = scmp.ne.s32.totalorder %s226_s29, %s1505_s25  ;;  %s1510_s30 = sshll.u32 %s1679_s12, 4  ;;  %s1511_s30 = int_to_ptr.vmem [resolvable:$false] %s1510_s30 }
  0x59   : > { %s1512_s14 = scalar_lea.vmem %s1511_s30, 2048  ;;  %p1513_p4 = scmp.lt.s32.totalorder %s226_s29, %s1511_s30 }
  0x5a   : > { %p1508_p8 = pnand %p1506_p0, %p1494_p11  ;;  %p1514_p12 = scmp.lt.s32.totalorder %s1512_s14, %s1505_s25 }
  0x5c   : > { %p1509_p9 = pneg %p1508_p8  ;;  %p1515_p6 = por %p1514_p12, %p1513_p4 }
  0x5e   : > { %p1516_p7 = pnand %p1515_p6, %p1509_p9 }
  0x60   : > { %1519 = shalt.err (!%p1516_p7)
}
  0x61   : > { %1286 = dma.hbm_to_vmem [thread:$0]  (!%p1896_p5), %s224_s16, 1024, %s226_s29, %s215_s11, %s2096_s8, %s2096_s8, %s2095_s7  }
  0x62   : > { %237 = sbr.rel (%p1810_p13) target bundleno = 658 (0x292), region = 36  ;;  %s239_s5 = sand.u32 (!%p1810_p13), 1, %s1648_s22  }
  0x63   : > { %s1020_s2 = sshll.u32 (!%p1810_p13), %s239_s5, 6  ;;  %s240_s3 = scalar_lea.sflag (!%p1810_p13), [#allocation4], %s239_s5 }
  0x64   : > { %s1912_s24 = scalar_lea.vmem (!%p1810_p13), [#allocation3], %s1020_s2 }
  0x67   : > { %1603 = dma.done.wait (%p1785_p3), %s240_s3, 1024  }
  0x68   : > { %1605 = vsyncadd (%p1785_p3), %s240_s3, 4294966272  ;;  %s2099_s18 = sld [smem:[#allocation18_spill]]  ;;  %s250_s7 = sand.u32 1, %s1636_s19  }
  0x69   : > { %s2100_s9 = sld [smem:[#allocation19_spill]]  ;;  %s1021_s8 = sshll.u32 %s250_s7, 6 }
  0x6a   : > { %s1920_s16 = scalar_lea.vmem [#allocation6], %s1021_s8 }
  0x6e   : > { %s248_s25 = sand.u32 1, %s2099_s18  }
  0x6f   : > { %s249_s10 = scalar_lea.sflag [#allocation7], %s248_s25  ;;  %p2101_p13 = scmp.ne.s32.totalorder %s2100_s9, 0 }
  0x71   : > { %1607 = dma.done.wait (%p2101_p13), %s249_s10, 1024  }
  0x72   : > { %1609 = vsyncadd (%p2101_p13), %s249_s10, 4294966272  ;;  %p2102_p2 = scmp.eq.s32.totalorder %s2099_s18, 0 }
  0x74   : > { %1611 = dma.done.wait (%p2102_p2), [#allocation7], 1024   ;;  %p2103_p10 = pmov %p2102_p2 }
  0x75   : > { %s2104_s6 = sld [smem:[#allocation15_spill]] }
  0x76   : > { %1613 = vsyncadd (%p2103_p10), [#allocation7], 4294966272  ;;  %s2105_s30 = sld [smem:[#allocation16_spill]] }
  0x7b   : > { %s283_s29 = sand.u32 1, %s2104_s6  }
  0x7c   : > { %s1023_s11 = sshll.u32 %s283_s29, 6  ;;  %p1024_p3 = scmp.ne.s32.totalorder %s2105_s30, 0 }
  0x7d   : > { %s1933_s12 = scalar_lea.vmem [#allocation9], %s1023_s11 }
  0x7e   : > { %293 = sbr.rel (%p1024_p3) target bundleno = 140 (0x8c), region = 52 }
  0x83   : > { %v1680_v0 = vmov 0.0  }
  0x84   : > { %294 = vst [vmem:[#allocation2 + $0x30] sm:$0xff] %v1680_v0  ;;  %295 = vst [vmem:[#allocation2] sm:$0xff] %v1680_v0 }
  0x85   : > { %296 = vst [vmem:[#allocation2 + $0x58] sm:$0xff] %v1680_v0  ;;  %297 = vst [vmem:[#allocation2 + $0x18] sm:$0xff] %v1680_v0 }
  0x86   : > { %298 = vst [vmem:[#allocation2 + $0x50] sm:$0xff] %v1680_v0  ;;  %299 = vst [vmem:[#allocation2 + $0x68] sm:$0xff] %v1680_v0 }
  0x87   : > { %300 = vst [vmem:[#allocation2 + $0x8] sm:$0xff] %v1680_v0  ;;  %301 = vst [vmem:[#allocation2 + $0x48] sm:$0xff] %v1680_v0 }
  0x88   : > { %302 = vst [vmem:[#allocation2 + $0x40] sm:$0xff] %v1680_v0  ;;  %303 = vst [vmem:[#allocation2 + $0x20] sm:$0xff] %v1680_v0 }
  0x89   : > { %304 = vst [vmem:[#allocation2 + $0x10] sm:$0xff] %v1680_v0  ;;  %305 = vst [vmem:[#allocation2 + $0x38] sm:$0xff] %v1680_v0 }
  0x8a   : > { %306 = vst [vmem:[#allocation2 + $0x60] sm:$0xff] %v1680_v0  ;;  %307 = vst [vmem:[#allocation2 + $0x70] sm:$0xff] %v1680_v0 }
  0x8b   : > { %308 = vst [vmem:[#allocation2 + $0x78] sm:$0xff] %v1680_v0  ;;  %309 = vst [vmem:[#allocation2 + $0x28] sm:$0xff] %v1680_v0 }
  0x8c PF: > { %v1414_v1 = vld [vmem:[%s1920_s16 + $0x38] sm:$0xff]   ;;  %v1415_v2 = vld [vmem:[%s1920_s16 + $0x30] sm:$0xff]   ;;  %v1416_v3 = vld [vmem:[%s1920_s16 + $0x28] sm:$0xff]   ;;  %s2106_s14 = sld [smem:[#allocation16_spill]] }
  0x8d   : > { %1170 = vmatprep.subr.bf16.mxu0 %v1414_v1  ;;  %1234 = vmatprep.subr.bf16.mxu1 %v1414_v1  ;;  %v1417_v4 = vld [vmem:[%s1920_s16 + $0x20] sm:$0xff]   ;;  %v1418_v7 = vld [vmem:[%s1920_s16 + $0x18] sm:$0xff]   ;;  %v1419_v8 = vld [vmem:[%s1920_s16 + $0x10] sm:$0xff]  }
  0x8e   : > { %1171 = vmatpush3.bf16.msra.mxu0 %v1414_v1  ;;  %1242 = vmatpush3.bf16.msra.mxu1 %v1414_v1  ;;  %v1422_v5 = vld [vmem:[%s1912_s24] sm:$0xff]   ;;  %v1420_v9 = vld [vmem:[%s1920_s16 + $0x8] sm:$0xff]   ;;  %v1426_v13 = vld [vmem:[%s1912_s24 + $0x10] sm:$0xff]  }
  0x8f   : > { %1172 = vmatprep.subr.bf16.mxu0 %v1415_v2  ;;  %1235 = vmatprep.subr.bf16.mxu1 %v1415_v2  ;;  %v1423_v6 = vld [vmem:[%s1912_s24 + $0x20] sm:$0xff]   ;;  %v1424_v11 = vld [vmem:[%s1912_s24 + $0x8] sm:$0xff]   ;;  %v1427_v14 = vld [vmem:[%s1912_s24 + $0x30] sm:$0xff]  }
  0x90   : > { %1186 = vmatprep.mubr.bf16.mxu0 %v1422_v5  ;;  %1194 = vmatprep.mubr.bf16.mxu1 %v1423_v6  ;;  %v1421_v10 = vld [vmem:[%s1920_s16] sm:$0xff]   ;;  %v1425_v12 = vld [vmem:[%s1912_s24 + $0x28] sm:$0xff]   ;;  %v1428_v15 = vld [vmem:[%s1912_s24 + $0x18] sm:$0xff]  }
  0x91   : > { %v1429_v16 = vld [vmem:[%s1912_s24 + $0x38] sm:$0xff]   ;;  %v320_v18 = vld [vmem:[#allocation2 + $0x10] sm:$0xff]  ;;  %v318_v22 = vld [vmem:[#allocation2 + $0x40] sm:$0xff] }
  0x92   : > { %1173 = vmatpush3.bf16.msra.mxu0 %v1415_v2  ;;  %1243 = vmatpush3.bf16.msra.mxu1 %v1415_v2  ;;  %v312_v17 = vld [vmem:[#allocation2 + $0x58] sm:$0xff]  ;;  %v310_v21 = vld [vmem:[#allocation2 + $0x30] sm:$0xff]  ;;  %v311_v33 = vld [vmem:[#allocation2] sm:$0xff]  ;;  %p1041_p1 = scmp.ne.s32.totalorder %s2106_s14, 1 }
  0x93   : > { %1174 = vmatprep.subr.bf16.mxu0 %v1416_v3  ;;  %1236 = vmatprep.subr.bf16.mxu1 %v1416_v3  ;;  %v313_v27 = vld [vmem:[#allocation2 + $0x18] sm:$0xff]  ;;  %v319_v34 = vld [vmem:[#allocation2 + $0x20] sm:$0xff]  ;;  %v316_v39 = vld [vmem:[#allocation2 + $0x8] sm:$0xff]  ;;  %s2107_s3 = sld [smem:[#allocation24_spill]] (!%p1041_p1) }
  0x94   : > { %v321_v28 = vld [vmem:[#allocation2 + $0x38] sm:$0xff]  ;;  %v314_v45 = vld [vmem:[#allocation2 + $0x50] sm:$0xff]  ;;  %v322_v46 = vld [vmem:[#allocation2 + $0x60] sm:$0xff] }
  0x95   : > { %v324_v40 = vld [vmem:[#allocation2 + $0x78] sm:$0xff]  ;;  %v317_v51 = vld [vmem:[#allocation2 + $0x48] sm:$0xff]  ;;  %v323_v58 = vld [vmem:[#allocation2 + $0x70] sm:$0xff] }
  0x96   : > { %1175 = vmatpush3.bf16.msra.mxu0 %v1416_v3  ;;  %1244 = vmatpush3.bf16.msra.mxu1 %v1416_v3  ;;  %v325_v52 = vld [vmem:[#allocation2 + $0x28] sm:$0xff] }
  0x97   : > { %1176 = vmatprep.subr.bf16.mxu0 %v1417_v4  ;;  %1237 = vmatprep.subr.bf16.mxu1 %v1417_v4  ;;  %v315_v57 = vld [vmem:[#allocation2 + $0x68] sm:$0xff] }
  0x9a   : > { %1177 = vmatpush3.bf16.msra.mxu0 %v1417_v4  ;;  %1245 = vmatpush3.bf16.msra.mxu1 %v1417_v4 }
  0x9b   : > { %1178 = vmatprep.subr.bf16.mxu0 %v1418_v7  ;;  %1238 = vmatprep.subr.bf16.mxu1 %v1418_v7 }
  0x9e   : > { %1179 = vmatpush3.bf16.msra.mxu0 %v1418_v7  ;;  %1246 = vmatpush3.bf16.msra.mxu1 %v1418_v7 }
  0x9f   : > { %1180 = vmatprep.subr.bf16.mxu0 %v1419_v8  ;;  %1239 = vmatprep.subr.bf16.mxu1 %v1419_v8 }
  0xa2   : > { %1181 = vmatpush3.bf16.msra.mxu0 %v1419_v8  ;;  %1247 = vmatpush3.bf16.msra.mxu1 %v1419_v8 }
  0xa3   : > { %1182 = vmatprep.subr.bf16.mxu0 %v1420_v9  ;;  %1240 = vmatprep.subr.bf16.mxu1 %v1420_v9 }
  0xa6   : > { %1183 = vmatpush3.bf16.msra.mxu0 %v1420_v9  ;;  %1248 = vmatpush3.bf16.msra.mxu1 %v1420_v9 }
  0xa7   : > { %1184 = vmatprep.subr.bf16.mxu0 %v1421_v10  ;;  %1241 = vmatprep.subr.bf16.mxu1 %v1421_v10 }
  0xaa   : > { %1185 = vmatpush3.bf16.msra.mxu0 %v1421_v10  ;;  %1249 = vmatpush3.bf16.msra.mxu1 %v1421_v10 }
  0xad   : > { %1187 = vmatmul.mubr.bf16.vlgmr.msra.gmra.mxu0 %v1424_v11  ;;  %1195 = vmatmul.mubr.bf16.vlgmr.msra.gmra.mxu1 %v1425_v12 }
  0xae   : > { %1190 = vmatprep.mubr.bf16.mxu0 %v1426_v13  ;;  %1198 = vmatprep.mubr.bf16.mxu1 %v1427_v14 }
  0xb5   : > { %1191 = vmatmul.mubr.bf16.gmra.mxu0 %v1428_v15  ;;  %1199 = vmatmul.mubr.bf16.gmra.mxu1 %v1429_v16 }
 0x16d   : > { %v1188_v19 = vpop.f32.mrf.mxu0  ;;  %v1196_v20 = vpop.f32.mrf.mxu1 }
 0x16e   : > { %v553_v23 = vadd.f32 %v1188_v19, %v312_v17  ;;  %v561_v24 = vadd.f32 %v1196_v20, %v320_v18 }
 0x16f   : > { %v488_v25 = vpop.f32.mrf.mxu0  ;;  %v520_v26 = vpop.f32.mrf.mxu1 }
 0x170   : > { %569 = vst [vmem:[#allocation2 + $0x58] sm:$0xff] %v553_v23  ;;  %577 = vst [vmem:[#allocation2 + $0x10] sm:$0xff] %v561_v24  ;;  %v551_v29 = vadd.f32 %v488_v25, %v310_v21  ;;  %v559_v30 = vadd.f32 %v520_v26, %v318_v22 }
 0x171   : > { %v1189_v31 = vpop.f32.mrf.mxu0  ;;  %v1197_v32 = vpop.f32.mrf.mxu1 }
 0x172   : > { %567 = vst [vmem:[#allocation2 + $0x30] sm:$0xff] %v551_v29  ;;  %575 = vst [vmem:[#allocation2 + $0x40] sm:$0xff] %v559_v30  ;;  %v554_v35 = vadd.f32 %v1189_v31, %v313_v27  ;;  %v562_v36 = vadd.f32 %v1197_v32, %v321_v28 }
 0x173   : > { %v491_v37 = vpop.f32.mrf.mxu0  ;;  %v523_v38 = vpop.f32.mrf.mxu1 }
 0x174   : > { %570 = vst [vmem:[#allocation2 + $0x18] sm:$0xff] %v554_v35  ;;  %578 = vst [vmem:[#allocation2 + $0x38] sm:$0xff] %v562_v36  ;;  %v552_v41 = vadd.f32 %v491_v37, %v311_v33  ;;  %v560_v42 = vadd.f32 %v523_v38, %v319_v34 }
 0x175   : > { %v1192_v43 = vpop.f32.mrf.mxu0  ;;  %v1200_v44 = vpop.f32.mrf.mxu1 }
 0x176   : > { %568 = vst [vmem:[#allocation2] sm:$0xff] %v552_v41  ;;  %576 = vst [vmem:[#allocation2 + $0x20] sm:$0xff] %v560_v42  ;;  %v557_v47 = vadd.f32 %v1192_v43, %v316_v39  ;;  %v565_v48 = vadd.f32 %v1200_v44, %v324_v40 }
 0x177   : > { %v504_v49 = vpop.f32.mrf.mxu0  ;;  %v536_v50 = vpop.f32.mrf.mxu1 }
 0x178   : > { %573 = vst [vmem:[#allocation2 + $0x8] sm:$0xff] %v557_v47  ;;  %581 = vst [vmem:[#allocation2 + $0x78] sm:$0xff] %v565_v48  ;;  %v555_v53 = vadd.f32 %v504_v49, %v314_v45  ;;  %v563_v54 = vadd.f32 %v536_v50, %v322_v46 }
 0x179   : > { %v1193_v55 = vpop.f32.mrf.mxu0  ;;  %v1201_v56 = vpop.f32.mrf.mxu1 }
 0x17a   : > { %571 = vst [vmem:[#allocation2 + $0x50] sm:$0xff] %v555_v53  ;;  %579 = vst [vmem:[#allocation2 + $0x60] sm:$0xff] %v563_v54  ;;  %v558_v59 = vadd.f32 %v1193_v55, %v317_v51  ;;  %v566_v60 = vadd.f32 %v1201_v56, %v325_v52  ;;  %586 = sbr.rel (%p1041_p1) target bundleno = 630 (0x276), region = 56 }
 0x17b   : > { %v507_v61 = vpop.f32.mrf.mxu0  ;;  %v539_v62 = vpop.f32.mrf.mxu1 }
 0x17c   : > { %574 = vst [vmem:[#allocation2 + $0x48] sm:$0xff] %v558_v59  ;;  %582 = vst [vmem:[#allocation2 + $0x28] sm:$0xff] %v566_v60  ;;  %v556_v63 = vadd.f32 %v507_v61, %v315_v57  ;;  %v564_v0 = vadd.f32 %v539_v62, %v323_v58 }
 0x17e   : > { %572 = vst [vmem:[#allocation2 + $0x68] sm:$0xff] %v556_v63  ;;  %580 = vst [vmem:[#allocation2 + $0x70] sm:$0xff] %v564_v0 }
 0x17f   : > { %v1430_v1 = vld [vmem:[#allocation8 + $0x38] sm:$0xff]   ;;  %v1431_v2 = vld [vmem:[#allocation8 + $0x30] sm:$0xff]   ;;  %v1432_v3 = vld [vmem:[#allocation8 + $0x28] sm:$0xff]  }
 0x180   : > { %1202 = vmatprep.subr.bf16.mxu0 %v1430_v1  ;;  %1250 = vmatprep.subr.bf16.mxu1 %v1430_v1  ;;  %v1433_v4 = vld [vmem:[#allocation8 + $0x20] sm:$0xff]   ;;  %v587_v5 = vld [vmem:[#allocation2 + $0x30] sm:$0xff]  ;;  %v1434_v11 = vld [vmem:[#allocation8 + $0x18] sm:$0xff]  }
 0x181   : > { %1203 = vmatpush3.bf16.msra.mxu0 %v1430_v1  ;;  %1258 = vmatpush3.bf16.msra.mxu1 %v1430_v1  ;;  %v588_v6 = vld [vmem:[#allocation2] sm:$0xff]  ;;  %v1435_v12 = vld [vmem:[#allocation8 + $0x10] sm:$0xff]   ;;  %v1436_v13 = vld [vmem:[#allocation8 + $0x8] sm:$0xff]  }
 0x182   : > { %1204 = vmatprep.subr.bf16.mxu0 %v1431_v2  ;;  %1251 = vmatprep.subr.bf16.mxu1 %v1431_v2  ;;  %v595_v7 = vld [vmem:[#allocation2 + $0x40] sm:$0xff]  ;;  %v603_v8 = vpack.c.bf16 %v588_v6, %v587_v5  ;;  %v589_v15 = vld [vmem:[#allocation2 + $0x58] sm:$0xff]  ;;  %v597_v17 = vld [vmem:[#allocation2 + $0x10] sm:$0xff] }
 0x183   : > { %v596_v9 = vld [vmem:[#allocation2 + $0x20] sm:$0xff]  ;;  %v590_v16 = vld [vmem:[#allocation2 + $0x18] sm:$0xff]  ;;  %v591_v19 = vld [vmem:[#allocation2 + $0x50] sm:$0xff] }
 0x184   : > { %v607_v10 = vpack.c.bf16 %v596_v9, %v595_v7  ;;  %1218 = vmatprep.mubr.bf16.mxu0 %v603_v8  ;;  %v1437_v14 = vld [vmem:[#allocation8] sm:$0xff]   ;;  %v598_v18 = vld [vmem:[#allocation2 + $0x38] sm:$0xff]  ;;  %v604_v23 = vpack.c.bf16 %v590_v16, %v589_v15  ;;  %v593_v27 = vld [vmem:[#allocation2 + $0x8] sm:$0xff] }
 0x185   : > { %1205 = vmatpush3.bf16.msra.mxu0 %v1431_v2  ;;  %1259 = vmatpush3.bf16.msra.mxu1 %v1431_v2  ;;  %v592_v20 = vld [vmem:[#allocation2 + $0x68] sm:$0xff]  ;;  %v599_v21 = vld [vmem:[#allocation2 + $0x60] sm:$0xff]  ;;  %v600_v22 = vld [vmem:[#allocation2 + $0x70] sm:$0xff]  ;;  %v608_v24 = vpack.c.bf16 %v598_v18, %v597_v17 }
 0x186   : > { %1206 = vmatprep.subr.bf16.mxu0 %v1432_v3  ;;  %1252 = vmatprep.subr.bf16.mxu1 %v1432_v3  ;;  %v605_v25 = vpack.c.bf16 %v592_v20, %v591_v19  ;;  %v609_v26 = vpack.c.bf16 %v600_v22, %v599_v21  ;;  %v594_v28 = vld [vmem:[#allocation2 + $0x48] sm:$0xff]  ;;  %v601_v29 = vld [vmem:[#allocation2 + $0x78] sm:$0xff]  ;;  %v1042_v33 = vld [vmem:[%s2107_s3] ss:$0 sm:$0xff] }
 0x187   : > { %1226 = vmatprep.mubr.bf16.mxu1 %v607_v10  ;;  %v602_v30 = vld [vmem:[#allocation2 + $0x28] sm:$0xff]  ;;  %v606_v31 = vpack.c.bf16 %v594_v28, %v593_v27 }
 0x188   : > { %v610_v32 = vpack.c.bf16 %v602_v30, %v601_v29 }
 0x189   : > { %1207 = vmatpush3.bf16.msra.mxu0 %v1432_v3  ;;  %1260 = vmatpush3.bf16.msra.mxu1 %v1432_v3 }
 0x18a   : > { %1208 = vmatprep.subr.bf16.mxu0 %v1433_v4  ;;  %1253 = vmatprep.subr.bf16.mxu1 %v1433_v4 }
 0x18d   : > { %1209 = vmatpush3.bf16.msra.mxu0 %v1433_v4  ;;  %1261 = vmatpush3.bf16.msra.mxu1 %v1433_v4 }
 0x18e   : > { %1210 = vmatprep.subr.bf16.mxu0 %v1434_v11  ;;  %1254 = vmatprep.subr.bf16.mxu1 %v1434_v11 }
 0x191   : > { %1211 = vmatpush3.bf16.msra.mxu0 %v1434_v11  ;;  %1262 = vmatpush3.bf16.msra.mxu1 %v1434_v11 }
 0x192   : > { %1212 = vmatprep.subr.bf16.mxu0 %v1435_v12  ;;  %1255 = vmatprep.subr.bf16.mxu1 %v1435_v12 }
 0x195   : > { %1213 = vmatpush3.bf16.msra.mxu0 %v1435_v12  ;;  %1263 = vmatpush3.bf16.msra.mxu1 %v1435_v12 }
 0x196   : > { %1214 = vmatprep.subr.bf16.mxu0 %v1436_v13  ;;  %1256 = vmatprep.subr.bf16.mxu1 %v1436_v13 }
 0x199   : > { %1215 = vmatpush3.bf16.msra.mxu0 %v1436_v13  ;;  %1264 = vmatpush3.bf16.msra.mxu1 %v1436_v13 }
 0x19a   : > { %1216 = vmatprep.subr.bf16.mxu0 %v1437_v14  ;;  %1257 = vmatprep.subr.bf16.mxu1 %v1437_v14 }
 0x19d   : > { %1217 = vmatpush3.bf16.msra.mxu0 %v1437_v14  ;;  %1265 = vmatpush3.bf16.msra.mxu1 %v1437_v14 }
 0x1a0   : > { %1219 = vmatmul.mubr.bf16.vlgmr.msra.gmra.mxu0 %v604_v23  ;;  %1227 = vmatmul.mubr.bf16.vlgmr.msra.gmra.mxu1 %v608_v24 }
 0x1a1   : > { %1222 = vmatprep.mubr.bf16.mxu0 %v605_v25  ;;  %1230 = vmatprep.mubr.bf16.mxu1 %v609_v26 }
 0x1a8   : > { %1223 = vmatmul.mubr.bf16.gmra.mxu0 %v606_v31  ;;  %1231 = vmatmul.mubr.bf16.gmra.mxu1 %v610_v32 }
 0x260   : > { %v1220_v34 = vpop.f32.mrf.mxu0  ;;  %v1228_v35 = vpop.f32.mrf.mxu1 }
 0x261   : > { %v725_v36 = vadd.f32 %v1220_v34, %v1042_v33  ;;  %v757_v37 = vadd.f32 %v1228_v35, %v1042_v33 }
 0x262   : > { %v716_v38 = vpop.f32.mrf.mxu0  ;;  %v748_v39 = vpop.f32.mrf.mxu1 }
 0x263   : > { %v717_v40 = vadd.f32 %v1042_v33, %v716_v38  ;;  %v749_v41 = vadd.f32 %v1042_v33, %v748_v39  ;;  %v781_v46 = vmax.f32 %v725_v36, 0.0  ;;  %v789_v47 = vmax.f32 %v757_v37, 0.0 }
 0x264   : > { %v1221_v42 = vpop.f32.mrf.mxu0  ;;  %v1229_v43 = vpop.f32.mrf.mxu1 }
 0x265   : > { %v728_v44 = vadd.f32 %v1221_v42, %v1042_v33  ;;  %v760_v45 = vadd.f32 %v1229_v43, %v1042_v33  ;;  %v779_v54 = vmax.f32 %v717_v40, 0.0  ;;  %v787_v55 = vmax.f32 %v749_v41, 0.0 }
 0x266   : > { %v719_v48 = vpop.f32.mrf.mxu0  ;;  %v751_v49 = vpop.f32.mrf.mxu1 }
 0x267   : > { %v782_v50 = vmax.f32 %v728_v44, 0.0  ;;  %v790_v51 = vmax.f32 %v760_v45, 0.0  ;;  %v720_v52 = vadd.f32 %v1042_v33, %v719_v48  ;;  %v752_v53 = vadd.f32 %v1042_v33, %v751_v49 }
 0x268   : > { %v1224_v56 = vpop.f32.mrf.mxu0  ;;  %v1232_v57 = vpop.f32.mrf.mxu1 }
 0x269   : > { %v1099_v58 = vpack.c.bf16 %v782_v50, %v781_v46  ;;  %v1119_v59 = vpack.c.bf16 %v790_v51, %v789_v47  ;;  %v780_v60 = vmax.f32 %v720_v52, 0.0  ;;  %v788_v61 = vmax.f32 %v752_v53, 0.0 }
 0x26a   : > { %v741_v62 = vadd.f32 %v1224_v56, %v1042_v33  ;;  %v773_v63 = vadd.f32 %v1232_v57, %v1042_v33  ;;  %v732_v0 = vpop.f32.mrf.mxu0  ;;  %v764_v1 = vpop.f32.mrf.mxu1 }
 0x26b   : > { %1131 = vst [vmem:[%s1933_s12 + $0x8] sm:$0xff] %v1099_v58   ;;  %1135 = vst [vmem:[%s1933_s12 + $0x28] sm:$0xff] %v1119_v59   ;;  %v1094_v2 = vpack.c.bf16 %v780_v60, %v779_v54  ;;  %v1114_v3 = vpack.c.bf16 %v788_v61, %v787_v55  ;;  %v733_v4 = vadd.f32 %v1042_v33, %v732_v0 }
 0x26c   : > { %v765_v5 = vadd.f32 %v1042_v33, %v764_v1  ;;  %v1225_v6 = vpop.f32.mrf.mxu0  ;;  %v1233_v7 = vpop.f32.mrf.mxu1  ;;  %v785_v10 = vmax.f32 %v741_v62, 0.0  ;;  %v793_v11 = vmax.f32 %v773_v63, 0.0 }
 0x26d   : > { %1095 = vst [vmem:[%s1933_s12] sm:$0xff] %v1094_v2   ;;  %1134 = vst [vmem:[%s1933_s12 + $0x20] sm:$0xff] %v1114_v3   ;;  %v744_v8 = vadd.f32 %v1225_v6, %v1042_v33  ;;  %v776_v9 = vadd.f32 %v1233_v7, %v1042_v33  ;;  %v783_v18 = vmax.f32 %v733_v4, 0.0 }
 0x26e   : > { %v735_v12 = vpop.f32.mrf.mxu0  ;;  %v767_v13 = vpop.f32.mrf.mxu1  ;;  %v791_v19 = vmax.f32 %v765_v5, 0.0 }
 0x26f   : > { %v786_v14 = vmax.f32 %v744_v8, 0.0  ;;  %v794_v15 = vmax.f32 %v776_v9, 0.0  ;;  %v736_v16 = vadd.f32 %v1042_v33, %v735_v12  ;;  %v768_v17 = vadd.f32 %v1042_v33, %v767_v13 }
 0x271   : > { %v1109_v20 = vpack.c.bf16 %v786_v14, %v785_v10  ;;  %v1129_v21 = vpack.c.bf16 %v794_v15, %v793_v11  ;;  %v784_v22 = vmax.f32 %v736_v16, 0.0  ;;  %v792_v23 = vmax.f32 %v768_v17, 0.0 }
 0x273   : > { %1133 = vst [vmem:[%s1933_s12 + $0x18] sm:$0xff] %v1109_v20   ;;  %1137 = vst [vmem:[%s1933_s12 + $0x38] sm:$0xff] %v1129_v21   ;;  %v1104_v24 = vpack.c.bf16 %v784_v22, %v783_v18  ;;  %v1124_v25 = vpack.c.bf16 %v792_v23, %v791_v19 }
 0x275   : > { %1132 = vst [vmem:[%s1933_s12 + $0x10] sm:$0xff] %v1104_v24   ;;  %1136 = vst [vmem:[%s1933_s12 + $0x30] sm:$0xff] %v1124_v25  }
 0x276 PF: > { %s2108_s24 = sld [smem:[#allocation17_spill]]  ;;  %s889_s6 = sshll.u32 %s1933_s12, 4  ;;  %s1971_s6 = int_to_ptr.vmem [resolvable:$true] %s889_s6 }
 0x277   : > { %s2110_s9 = sld [smem:[#allocation20_spill]]  ;;  %s1975_s11 = scalar_lea.sflag [#allocation5], %s283_s29 }
 0x278   : > { %s2111_s10 = sld [smem:[#allocation25_spill]]  ;;  %s1520_s30 = scalar_lea.vmem %s1971_s6, 1024 }
 0x279   : > { %p1521_p5 = scmp.ne.s32.totalorder %s1971_s6, %s1520_s30  ;;  %s1681_s14 = smov [#allocation9]  }
 0x27a   : > { %s1524_s5 = sshll.u32 %s1681_s14, 4  ;;  %s1525_s5 = int_to_ptr.vmem [resolvable:$false] %s1524_s5 }
 0x27b   : > { %s1526_s2 = scalar_lea.vmem %s1525_s5, 2048  ;;  %p1527_p9 = scmp.lt.s32.totalorder %s1971_s6, %s1525_s5 }
 0x27c   : > { %s1090_s25 = sshll.u32 %s2108_s24, 10  ;;  %p1528_p4 = scmp.lt.s32.totalorder %s1526_s2, %s1520_s30 }
 0x27d   : > { %p2112_p11 = scmp.ne.s32.totalorder %s2110_s9, 0 }
 0x27e   : > { %s1968_s16 = scalar_lea.hbm %s2111_s10, %s1090_s25  ;;  %p1529_p12 = por %p1528_p4, %p1527_p9 }
 0x27f   : > { %p1522_p0 = pnand %p1521_p5, %p2112_p11 }
 0x281   : > { %p1523_p8 = pneg %p1522_p0 }
 0x283   : > { %p1530_p6 = pnand %p1529_p12, %p1523_p8 }
 0x285   : > { %1533 = shalt.err (!%p1530_p6)
}
 0x286   : > { %s1534_s29 = scalar_lea.hbm %s1968_s16, 1024  ;;  %s1538_s24 = scalar_lea.hbm %s2111_s10, 2048 }
 0x287   : > { %p1535_p7 = scmp.ne.s32.totalorder %s1968_s16, %s1534_s29  ;;  %p1539_p10 = scmp.lt.s32.totalorder %s1968_s16, %s2111_s10 }
 0x288   : > { %p1540_p3 = scmp.lt.s32.totalorder %s1538_s24, %s1534_s29 }
 0x289   : > { %p1536_p13 = pnand %p1535_p7, %p2112_p11 }
 0x28a   : > { %p1541_p1 = por %p1540_p3, %p1539_p10 }
 0x28b   : > { %p1537_p2 = pneg %p1536_p13 }
 0x28d   : > { %p1542_p5 = pnand %p1541_p1, %p1537_p2 }
 0x28f   : > { %1545 = shalt.err (!%p1542_p5)
}
 0x290   : > { %s1682_s7 = smov 64   ;;  %s1683_s8 = smov 4  }
 0x291   : > { %1274 = dma.vmem_to_hbm [thread:$0]  (%p2112_p11), %s1971_s6, 1024, %s1968_s16, %s1975_s11, %s1682_s7, %s1682_s7, %s1683_s8  }
 0x292 PF: > { %s2113_s30 = sld [smem:[#allocation14_spill]]  ;;  %p1294_p0 = scmp.ge.s32.totalorder %s1672_s28, 2 }
 0x293   : > { %s2114_s14 = sld [smem:[#allocation21_spill]] }
 0x298   : > { %s904_s5 = sand.u32 1, %s2113_s30  }
 0x299   : > { %p2115_p8 = scmp.ne.s32.totalorder %s2114_s14, 0  ;;  %s905_s2 = scalar_lea.sflag [#allocation5], %s904_s5 }
 0x29b   : > { %p1288_p9 = pnand %p1294_p0, %p2115_p8 }
 0x29d   : > { %p1289_p4 = pneg %p1288_p9 }
 0x29f   : > { %1615 = dma.done.wait (%p1289_p4), %s905_s2, 1024  }
 0x2a0   : > { %1617 = vsyncadd (%p1289_p4), %s905_s2, 4294966272  ;;  %s23_s28 = sadd.s32 1, %s1672_s28   ;;  %s2117_s9 = sld [smem:[#allocation15_spill]] }
 0x2a1   : > { %p2003_p12 = scmp.ge.s32.totalorder %s23_s28, 6   ;;  %s2118_s6 = smov %s1855_s15 }
 0x2a2   : > { %s2119_s11 = sld [smem:[#allocation22_spill]]  ;;  %s2121_s16 = smov %s1628_s17 }
 0x2a3   : > { %s2122_s17 = smov %s2118_s6  ;;  %s2123_s18 = smov %s1636_s19 }
 0x2a4   : > { %s2124_s19 = smov %s1640_s20  ;;  %s2125_s20 = smov %s1885_s21 }
 0x2a5   : > { %s2126_s21 = smov %s1648_s22  ;;  %s2127_s22 = smov %s1652_s23 }
 0x2a6   : > { %s2120_s15 = smov %s2117_s9  ;;  %s2128_s23 = smov %s1858_s4 }
 0x2a7   : > { %s2129_s24 = smov %s1664_s26  ;;  %s2130_s25 = smov %s1668_s27 }
 0x2a8   : > { %s2131_s26 = smov %s2119_s11  ;;  %s2132_s27 = smov %s2138_s13 }
 0x2a9   :  { %22 = sbr.rel (!%p2003_p12) target bundleno = 16 (0x10), region = 106 }
 0x2ae   :  { %910 = vsyncpa [#allocation4], 1 }
 0x2af   :  { %912 = vsyncpa [#allocation4 + $0x1], 1 }
 0x2b0   :  { %913 = vsyncpa [#allocation7], 1 }
 0x2b1   :  { %915 = vsyncpa [#allocation7 + $0x1], 1 }
 0x2b2   :  { %916 = vsyncpa [#allocation5], 1 }
 0x2b3   :  { %918 = vsyncpa [#allocation5 + $0x1], 1 }

</bundles_post_ra>
